<compile_context>
chip_gen: v5e
topology: v5e:2x2
jax: 0.10.0
libtpu: 0.0.40
codegen_flags: <defaults>
</compile_context>

<pallas_src>
import functools

import jax
import jax.numpy as jnp
from jax import lax
from jax.experimental import pallas as pl
from jax.experimental.pallas import tpu as pltpu

SMOOTH = 1e-5
W_DICE = 0.5
W_CE = 0.5
MAX_TILE_HW = 32768  # lane-dim tile size; sweepable in 4096..32768


def _round_up(x, m):
    return ((x + m - 1) // m) * m


def _combined_loss_kernel(x_ref, t_ref, inter_ref, ce_ref, *, hw, tile, needs_mask):
    # x_ref:     (C, TILE) logits for one batch row, one pixel tile
    # t_ref:     (1, TILE) i32 target class per pixel
    # inter_ref: (1, TILE) f32 per-lane partial sums of softmax[target]
    # ce_ref:    (1, TILE) f32 per-lane partial sums of -log_softmax[target]
    j = pl.program_id(1)

    @pl.when(j == 0)
    def _():
        inter_ref[...] = jnp.zeros_like(inter_ref)
        ce_ref[...] = jnp.zeros_like(ce_ref)

    x = x_ref[...].astype(jnp.float32)                    # (C, TILE)
    t = t_ref[...]                                        # (1, TILE)

    if needs_mask:
        # Mask lanes past the end of the pixel axis (remainder tile only).
        lane = lax.broadcasted_iota(jnp.int32, (1, tile), 1)
        valid = (j * tile + lane) < hw                    # (1, TILE) bool
        validf = valid.astype(jnp.float32)
        # Zero padded lanes so exp/log stay finite; contributions are masked.
        x = jnp.where(valid, x, 0.0)

    # Per-pixel log-softmax pieces; no full softmax materialized.
    m = jnp.max(x, axis=0, keepdims=True)                 # (1, TILE)
    s = jnp.sum(jnp.exp(x - m), axis=0, keepdims=True)    # (1, TILE)

    cls = lax.broadcasted_iota(jnp.int32, x.shape, 0)     # class idx per sublane
    onehot = (cls == t).astype(jnp.float32)               # (C, TILE)
    x_t = jnp.sum(x * onehot, axis=0, keepdims=True)      # logit at target

    nll = m + jnp.log(s) - x_t                            # -log_softmax at target
    p_t = jnp.exp(-nll)                                   # softmax prob of target

    if needs_mask:
        inter_ref[...] += p_t * validf
        ce_ref[...] += nll * validf
    else:
        inter_ref[...] += p_t
        ce_ref[...] += nll


def combined_loss(predictions, targets,
                  weight_dice=W_DICE, weight_ce=W_CE, smooth=SMOOTH):
    """predictions: (N, C, H, W) float logits; targets: (N, 1, H, W) int."""
    n, c, h, w = predictions.shape
    hw = h * w
    p_total = n * hw

    tile = min(MAX_TILE_HW, _round_up(hw, 128))
    num_tiles = pl.cdiv(hw, tile)
    needs_mask = (hw % tile) != 0

    # Free reshapes only (merge trailing spatial dims); no transpose / pad /
    # cast pass on the host side.
    x = predictions.reshape(n, c, hw)
    t = targets.reshape(n, 1, hw).astype(jnp.int32)

    kernel = functools.partial(
        _combined_loss_kernel, hw=hw, tile=tile, needs_mask=needs_mask)

    inter_part, ce_part = pl.pallas_call(
        kernel,
        out_shape=(
            jax.ShapeDtypeStruct((n, 1, tile), jnp.float32),
            jax.ShapeDtypeStruct((n, 1, tile), jnp.float32),
        ),
        grid_spec=pltpu.PrefetchScalarGridSpec(
            num_scalar_prefetch=0,
            grid=(n, num_tiles),
            in_specs=[
                pl.BlockSpec((None, c, tile), lambda b, j: (b, 0, j)),
                pl.BlockSpec((None, 1, tile), lambda b, j: (b, 0, j)),
            ],
            out_specs=(
                pl.BlockSpec((None, 1, tile), lambda b, j: (b, 0, 0)),
                pl.BlockSpec((None, 1, tile), lambda b, j: (b, 0, 0)),
            ),
        ),
        compiler_params=pltpu.CompilerParams(
            dimension_semantics=("parallel", "arbitrary"),
            vmem_limit_bytes=32 * 1024 * 1024,
        ),
    )(x, t)

    intersection = jnp.sum(inter_part)
    ce_sum = jnp.sum(ce_part)

    # softmax sums to exactly 1 per pixel and one-hot sums to 1 per pixel, so
    # pred_sum == tgt_sum == p_total (matches the reference up to f32 rounding).
    pix = jnp.float32(p_total)
    dice = (2.0 * intersection + smooth) / (pix + pix + smooth)
    dice_loss = 1.0 - dice
    ce_loss = ce_sum / pix
    return weight_dice * dice_loss + weight_ce * ce_loss


def combined_loss_ref(predictions, targets,
                      weight_dice=W_DICE, weight_ce=W_CE, smooth=SMOOTH):
    """Pure-JAX reference mirroring the PyTorch module."""
    n, c, h, w = predictions.shape
    logp = jax.nn.log_softmax(predictions.astype(jnp.float32), axis=1)
    p = jnp.exp(logp)
    t = targets.reshape(n, h, w)
    onehot = jax.nn.one_hot(t, c, axis=1, dtype=jnp.float32)   # (N, C, H, W)
    inter = jnp.sum(p * onehot)
    dice = (2.0 * inter + smooth) / (jnp.sum(p) + jnp.sum(onehot) + smooth)
    dice_loss = 1.0 - dice
    ce_loss = -jnp.mean(jnp.sum(logp * onehot, axis=1))
    return weight_dice * dice_loss + weight_ce * ce_loss


if __name__ == "__main__":
    key = jax.random.PRNGKey(0)
    k1, k2 = jax.random.split(key)

    N, C, H, W = 2, 4, 16, 16
    predictions = jax.random.normal(k1, (N, C, H, W), dtype=jnp.float32)
    targets = jax.random.randint(k2, (N, 1, H, W), 0, C, dtype=jnp.int32)

    out = combined_loss(predictions, targets)
    out = jax.block_until_ready(out)

    ref = combined_loss_ref(predictions, targets)
    assert jnp.allclose(out, ref, rtol=1e-5, atol=1e-5), (out, ref)

    print("KERNEL_OK")
</pallas_src>

<mosaic_0001>
module attributes {stable_mosaic.version = 11 : i64} {
  func.func @_combined_loss_kernel(%arg0: i32, %arg1: i32, %arg2: memref<1x4x256xf32, #tpu.memory_space<vmem>>, %arg3: memref<1x1x256xi32, #tpu.memory_space<vmem>>, %arg4: memref<1x1x256xf32, #tpu.memory_space<vmem>>, %arg5: memref<1x1x256xf32, #tpu.memory_space<vmem>>) attributes {dimension_semantics = [#tpu.dimension_semantics<parallel>, #tpu.dimension_semantics<arbitrary>], iteration_bounds = array<i64: 2, 1>, scalar_prefetch = 0 : i64, scratch_operands = 0 : i64, tpu.core_type = #tpu.core_type<tc>, window_params = [{transform_indices = @transform_0, window_bounds = array<i64: 1, 4, 256>}, {transform_indices = @transform_1, window_bounds = array<i64: 1, 1, 256>}, {transform_indices = @transform_2, window_bounds = array<i64: 1, 1, 256>}, {transform_indices = @transform_3, window_bounds = array<i64: 1, 1, 256>}]} {
    %c0_i32 = arith.constant 0 : i32
    %0 = arith.cmpi eq, %arg1, %c0_i32 : i32
    %1 = arith.extui %0 : i1 to i32
    %c0_i32_0 = arith.constant 0 : i32
    %2 = arith.cmpi ne, %1, %c0_i32_0 : i32
    scf.if %2 {
      %cst_21 = arith.constant 0.000000e+00 : f32
      %40 = vector.broadcast %cst_21 : f32 to vector<1x256xf32>
      %c0_22 = arith.constant 0 : index
      %c0_23 = arith.constant 0 : index
      %c0_24 = arith.constant 0 : index
      %41 = vector.load %arg4[%c0_22, %c0_23, %c0_24] : memref<1x1x256xf32, #tpu.memory_space<vmem>>, vector<1x1x256xf32>
      %42 = vector.shape_cast %41 : vector<1x1x256xf32> to vector<1x256xf32>
      %43 = vector.shape_cast %40 : vector<1x256xf32> to vector<1x1x256xf32>
      tpu.vector_store %arg4[%c0_22, %c0_23, %c0_24], %43 {strides = array<i32>} : memref<1x1x256xf32, #tpu.memory_space<vmem>>, vector<1x1x256xf32>,
      %cst_25 = arith.constant 0.000000e+00 : f32
      %44 = vector.broadcast %cst_25 : f32 to vector<1x256xf32>
      %c0_26 = arith.constant 0 : index
      %c0_27 = arith.constant 0 : index
      %c0_28 = arith.constant 0 : index
      %45 = vector.load %arg5[%c0_26, %c0_27, %c0_28] : memref<1x1x256xf32, #tpu.memory_space<vmem>>, vector<1x1x256xf32>
      %46 = vector.shape_cast %45 : vector<1x1x256xf32> to vector<1x256xf32>
      %47 = vector.shape_cast %44 : vector<1x256xf32> to vector<1x1x256xf32>
      tpu.vector_store %arg5[%c0_26, %c0_27, %c0_28], %47 {strides = array<i32>} : memref<1x1x256xf32, #tpu.memory_space<vmem>>, vector<1x1x256xf32>,
    } else {
    }
    %c0 = arith.constant 0 : index
    %c0_1 = arith.constant 0 : index
    %c0_2 = arith.constant 0 : index
    %3 = vector.load %arg2[%c0, %c0_1, %c0_2] : memref<1x4x256xf32, #tpu.memory_space<vmem>>, vector<1x4x256xf32>
    %4 = vector.shape_cast %3 : vector<1x4x256xf32> to vector<4x256xf32>
    %c0_3 = arith.constant 0 : index
    %c0_4 = arith.constant 0 : index
    %c0_5 = arith.constant 0 : index
    %5 = vector.load %arg3[%c0_3, %c0_4, %c0_5] : memref<1x1x256xi32, #tpu.memory_space<vmem>>, vector<1x1x256xi32>
    %6 = vector.shape_cast %5 : vector<1x1x256xi32> to vector<1x256xi32>
    %cst = arith.constant dense<0xFF800000> : vector<256xf32>
    %7 = vector.multi_reduction <maximumf>, %4, %cst [0] : vector<4x256xf32> to vector<256xf32>
    %8 = vector.shape_cast %7 : vector<256xf32> to vector<1x256xf32>
    %9 = vector.broadcast %8 : vector<1x256xf32> to vector<4x256xf32>
    %10 = arith.subf %4, %9 : vector<4x256xf32>
    %11 = math.exp %10 : vector<4x256xf32>
    %cst_6 = arith.constant dense<0.000000e+00> : vector<256xf32>
    %12 = vector.multi_reduction <add>, %11, %cst_6 [0] : vector<4x256xf32> to vector<256xf32>
    %13 = vector.shape_cast %12 : vector<256xf32> to vector<1x256xf32>
    %14 = tpu.iota {dimensions = array<i32: 0>} : vector<4x256xi32>
    %15 = vector.broadcast %6 : vector<1x256xi32> to vector<4x256xi32>
    %16 = arith.cmpi eq, %14, %15 : vector<4x256xi32>
    %17 = arith.extui %16 : vector<4x256xi1> to vector<4x256xi32>
    %18 = arith.sitofp %17 : vector<4x256xi32> to vector<4x256xf32>
    %19 = arith.mulf %4, %18 : vector<4x256xf32>
    %cst_7 = arith.constant dense<0.000000e+00> : vector<256xf32>
    %20 = vector.multi_reduction <add>, %19, %cst_7 [0] : vector<4x256xf32> to vector<256xf32>
    %21 = vector.shape_cast %20 : vector<256xf32> to vector<1x256xf32>
    %22 = math.log %13 : vector<1x256xf32>
    %23 = arith.addf %8, %22 : vector<1x256xf32>
    %24 = arith.subf %23, %21 : vector<1x256xf32>
    %cst_8 = arith.constant 0.000000e+00 : f32
    %25 = vector.broadcast %cst_8 : f32 to vector<1x256xf32>
    %26 = arith.subf %25, %24 : vector<1x256xf32>
    %27 = math.exp %26 : vector<1x256xf32>
    %c0_9 = arith.constant 0 : index
    %c0_10 = arith.constant 0 : index
    %c0_11 = arith.constant 0 : index
    %28 = vector.load %arg4[%c0_9, %c0_10, %c0_11] : memref<1x1x256xf32, #tpu.memory_space<vmem>>, vector<1x1x256xf32>
    %29 = vector.shape_cast %28 : vector<1x1x256xf32> to vector<1x256xf32>
    %30 = arith.addf %29, %27 : vector<1x256xf32>
    %c0_12 = arith.constant 0 : index
    %c0_13 = arith.constant 0 : index
    %c0_14 = arith.constant 0 : index
    %31 = vector.load %arg4[%c0_12, %c0_13, %c0_14] : memref<1x1x256xf32, #tpu.memory_space<vmem>>, vector<1x1x256xf32>
    %32 = vector.shape_cast %31 : vector<1x1x256xf32> to vector<1x256xf32>
    %33 = vector.shape_cast %30 : vector<1x256xf32> to vector<1x1x256xf32>
    tpu.vector_store %arg4[%c0_12, %c0_13, %c0_14], %33 {strides = array<i32>} : memref<1x1x256xf32, #tpu.memory_space<vmem>>, vector<1x1x256xf32>,
    %c0_15 = arith.constant 0 : index
    %c0_16 = arith.constant 0 : index
    %c0_17 = arith.constant 0 : index
    %34 = vector.load %arg5[%c0_15, %c0_16, %c0_17] : memref<1x1x256xf32, #tpu.memory_space<vmem>>, vector<1x1x256xf32>
    %35 = vector.shape_cast %34 : vector<1x1x256xf32> to vector<1x256xf32>
    %36 = arith.addf %35, %24 : vector<1x256xf32>
    %c0_18 = arith.constant 0 : index
    %c0_19 = arith.constant 0 : index
    %c0_20 = arith.constant 0 : index
    %37 = vector.load %arg5[%c0_18, %c0_19, %c0_20] : memref<1x1x256xf32, #tpu.memory_space<vmem>>, vector<1x1x256xf32>
    %38 = vector.shape_cast %37 : vector<1x1x256xf32> to vector<1x256xf32>
    %39 = vector.shape_cast %36 : vector<1x256xf32> to vector<1x1x256xf32>
    tpu.vector_store %arg5[%c0_18, %c0_19, %c0_20], %39 {strides = array<i32>} : memref<1x1x256xf32, #tpu.memory_space<vmem>>, vector<1x1x256xf32>,
    return
  }
  func.func @transform_0(%arg0: i32, %arg1: i32) -> (i32, i32, i32) {
    %c0_i32 = arith.constant 0 : i32
    %c0_i32_0 = arith.constant 0 : i32
    return %arg0, %c0_i32, %arg1 : i32, i32, i32
  }
  func.func @transform_1(%arg0: i32, %arg1: i32) -> (i32, i32, i32) {
    %c0_i32 = arith.constant 0 : i32
    %c0_i32_0 = arith.constant 0 : i32
    return %arg0, %c0_i32, %arg1 : i32, i32, i32
  }
  func.func @transform_2(%arg0: i32, %arg1: i32) -> (i32, i32, i32) {
    %c0_i32 = arith.constant 0 : i32
    %c0_i32_0 = arith.constant 0 : i32
    %c0_i32_1 = arith.constant 0 : i32
    return %arg0, %c0_i32, %c0_i32_0 : i32, i32, i32
  }
  func.func @transform_3(%arg0: i32, %arg1: i32) -> (i32, i32, i32) {
    %c0_i32 = arith.constant 0 : i32
    %c0_i32_0 = arith.constant 0 : i32
    %c0_i32_1 = arith.constant 0 : i32
    return %arg0, %c0_i32, %c0_i32_0 : i32, i32, i32
  }
}

</mosaic_0001>

<bundles_post_ra>
// kernel: tpu_custom_call.1
= control target key start
LH: loop header
LB: loop body
LE: loop exit
PB: predicated region body
PF: predicated region fallthrough
CT: control target
= control target key end

     0   :  { %9 = vsyncpa [#allocation3], 0  ;;  %s1077_s0 = inlined_call_operand.hbm [shape: f32[2,4,256], index: 0, kind: input, shape index: {}]   ;;  %s1078_s1 = inlined_call_operand.hbm [shape: s32[2,1,256], index: 1, kind: input, shape index: {}]   ;;  %s1079_s2 = inlined_call_operand.hbm [shape: f32[2,1,256], index: 2, kind: output, shape index: {0}]   ;;  %s1080_s3 = inlined_call_operand.hbm [shape: f32[2,1,256], index: 3, kind: output, shape index: {1}]  }
   0x1   :  { %11 = vsyncpa [#allocation3 + $0x1], 0 }
   0x2   :  { %12 = vsyncpa [#allocation6], 0 }
   0x3   :  { %14 = vsyncpa [#allocation6 + $0x1], 0 }
   0x4   :  { %15 = vsyncpa [#allocation4], 0 }
   0x5   :  { %17 = vsyncpa [#allocation4 + $0x1], 0 }
   0x6   :  { %18 = vsyncpa [#allocation9], 0 }
   0x7   :  { %20 = vsyncpa [#allocation9 + $0x1], 0  ;;  %s874_s12 = smov 0   ;;  %s876_s13 = smov 0  }
   0x8   :  { %s878_s14 = smov 0   ;;  %s880_s15 = smov 0  }
   0x9   :  { %s882_s16 = smov 0   ;;  %s884_s17 = smov 0  }
   0xa LB: > { %s567_s18 = sadd.s32 4294967295, %s851_s17   ;;  %s568_s19 = sadd.s32 4294967294, %s851_s17   ;;  %s851_s17 = sphi %s884_s17, %s26_s17   ;;  %s847_s16 = sphi %s882_s16, %s1092_s16   ;;  %s843_s15 = sphi %s880_s15, %s1091_s15   ;;  %s839_s14 = sphi %s878_s14, %s1090_s14   ;;  %s835_s13 = sphi %s876_s13, %s1089_s13   ;;  %s831_s12 = sphi %s874_s12, %s1088_s12  }
   0xb   : > { %s38_s20 = sadd.s32 1, %s847_s16  ;;  %s47_s21 = sadd.s32 1, %s839_s14 }
   0xc   : > { %p40_p0 = scmp.ge.s32.totalorder %s38_s20, 2  ;;  %p54_p1 = scmp.ne.s32.totalorder %s839_s14, %s835_s13 }
   0xd   : > { %p55_p2 = scmp.eq.s32.totalorder %s851_s17, 0  ;;  %p60_p3 = scmp.ne.s32.totalorder %s835_s13, %s831_s12 }
   0xe   : > { %s1094_s20 = smov (%p40_p0, %s38_s20), 0  ;;  %p61_p5 = scmp.eq.s32.totalorder %s567_s18, 0 }
   0xf   : > { %p915_p4 = por %p55_p2, %p54_p1  ;;  %s42_s23 = ssub.s32 %s847_s16, %s1094_s20 }
  0x10   : > { %p112_p6 = scmp.eq.s32.totalorder %s567_s18, 1  ;;  %p45_p7 = scmp.eq.s32.totalorder %s42_s23, 0 }
  0x11   : > { %p921_p8 = por %p61_p5, %p60_p3  ;;  %p118_p10 = scmp.eq.s32.totalorder %s568_s19, 1 }
  0x12   : > { %p925_p9 = por %p112_p6, %p54_p1  ;;  %p570_p12 = scmp.ge.s32.totalorder %s851_s17, 2 }
  0x13   : > { %s930_s26 = scalar_select %p45_p7, %s839_s14, %s47_s21  }
  0x14   : > { %p932_p11 = por %p118_p10, %p60_p3  ;;  %p612_p13 = scmp.lt.s32.totalorder %s851_s17, 2 }
  0x15   : > { %s164_s28 = sand.u32 1, %s839_s14   ;;  %s589_s30 = sshll.u32 %s847_s16, 3 }
  0x16   : > { %s571_s29 = sshll.u32 %s164_s28, 3  ;;  %s175_s6 = scalar_lea.hbm %s1077_s0, %s589_s30 }
  0x17   : > { %s168_s7 = scalar_lea.vmem [#allocation2], %s571_s29  ;;  %s177_s9 = sshll.u32 %s175_s6, 4  ;;  %s178_s9 = int_to_ptr.hbm [resolvable:$true] %s177_s9 }
  0x18   : > { %s179_s8 = sshll.u32 %s168_s7, 4  ;;  %p945_p0 = pnand %p612_p13, %p915_p4  ;;  %s180_s8 = int_to_ptr.vmem [resolvable:$true] %s179_s8 }
  0x19   : > { %p576_p1 = scmp.ge.s32.totalorder %s851_s17, 1  ;;  %p205_p2 = scmp.lt.s32.totalorder %s851_s17, 3 }
  0x1a   : > { %s165_s11 = scalar_lea.sflag [#allocation3], %s164_s28  ;;  %s574_s18 = sshll.u32 %s164_s28, 1 }
  0x1b   : > { %601 = dma.hbm_to_vmem [thread:$0]  (!%p945_p0), %s178_s9, 128, %s180_s8, %s165_s11  }
  0x1c   : > { %p206_p3 = pnand %p576_p1, %p205_p2  ;;  %s575_s19 = sshll.u32 %s847_s16, 1 }
  0x1d   : > { %s196_s29 = scalar_lea.hbm %s1078_s1, %s575_s19  ;;  %s190_s30 = scalar_lea.vmem [#allocation5], %s574_s18 }
  0x1e   : > { %s200_s22 = sshll.u32 %s190_s30, 4  ;;  %s198_s4 = sshll.u32 %s196_s29, 4  ;;  %s201_s22 = int_to_ptr.vmem [resolvable:$true] %s200_s22  ;;  %s199_s4 = int_to_ptr.hbm [resolvable:$true] %s198_s4 }
  0x1f   : > { %s187_s5 = scalar_lea.sflag [#allocation6], %s164_s28  ;;  %209 = sbr.rel (%p206_p3) target bundleno = 133 (0x85), region = 28 }
  0x20   : > { %604 = dma.hbm_to_vmem [thread:$0]  (!%p945_p0), %s199_s4, 32, %s201_s22, %s187_s5  }
  0x21   : > { %s960_s6 = sand.u32 (!%p206_p3), 1, %s835_s13  }
  0x22   : > { %s577_s7 = sshll.u32 (!%p206_p3), %s960_s6, 3  ;;  %s212_s8 = scalar_lea.sflag (!%p206_p3), [#allocation3], %s960_s6 }
  0x23   : > { %s215_s9 = scalar_lea.vmem (!%p206_p3), [#allocation2], %s577_s7 }
  0x24   : > { %814 = dma.done.wait (%p921_p8), %s212_s8, 128  }
  0x25   : > { %816 = vsyncadd (%p921_p8), %s212_s8, 4294967168  ;;  %s969_s28 = sshll.u32 %s960_s6, 1  ;;  %s222_s10 = scalar_lea.sflag [#allocation6], %s960_s6 }
  0x26   : > { %s225_s11 = scalar_lea.vmem [#allocation5], %s969_s28 }
  0x27   : > { %818 = dma.done.wait (%p921_p8), %s222_s10, 32  }
  0x28   : > { %820 = vsyncadd (%p921_p8), %s222_s10, 4294967264  ;;  %v271_v0 = vld [vmem:[%s215_s9] sm:$0xff]  ;;  %vm279_vm0 = vcmask 1043456   ;;  %v265_v15 = vlaneseq  ;;  %v272_v16 = vld [vmem:[%s225_s11] sm:$0x3]  ;;  %s991_s24 = scalar_lea.vmem [#allocation8], %s969_s28 }
  0x29   : > { %274 = vst [vmem:[#allocation1] ss:$2 sm:$0xff] %v271_v0  ;;  %v325_v21 = vperm.slane %v272_v16, 1  ;;  %v324_v26 = vperm.slane %v272_v16, 0  ;;  %v853_v27 = vmov 0.0   ;;  %s997_s18 = scalar_lea.vmem [#allocation7], %s969_s28 }
  0x2a   : > { %v323_v20 = vshrl.u32 %v265_v15, 7  ;;  %vm986_vm1 = vcmp.lt.s32.totalorder %v265_v15, 256  ;;  %s585_s19 = sshll.u32 %s843_s15, 1  ;;  %vm376_vm4 = vcmask 1040384   ;;  %s425_s30 = sshll.u32 %s991_s24, 4  ;;  %s426_s30 = int_to_ptr.vmem [resolvable:$true] %s425_s30 }
  0x2b   : > { %270 = vst.msk [vmem:[%s991_s24] sm:$0x3] %vm986_vm1, %v853_v27  ;;  %s423_s29 = scalar_lea.hbm %s1080_s3, %s585_s19  ;;  %s399_s4 = scalar_lea.sflag [#allocation9], %s960_s6 }
  0x2c   : > { %vm327_vm2 = vcmp.eq.s32.totalorder %v323_v20, %v325_v21  ;;  %269 = vst.msk [vmem:[%s997_s18] sm:$0x3] %vm986_vm1, %v853_v27  ;;  %vm326_vm3 = vcmp.eq.s32.totalorder %v323_v20, %v324_v26  ;;  %s427_s22 = sshll.u32 %s423_s29, 4  ;;  %s753_s28 = scalar_lea.hbm %s1080_s3, 4  ;;  %s428_s22 = int_to_ptr.hbm [resolvable:$true] %s427_s22 }
  0x2d   : > { %v582_v28 = vsel %vm327_vm2, 1.0, %v853_v27  ;;  %v581_v30 = vsel %vm326_vm3, 1.0, %v853_v27  ;;  %s747_s5 = sshra.s32 %s428_s22, 4  ;;  %s748_s5 = int_to_ptr.hbm [resolvable:$true] %s747_s5 }
  0x2e   : > { %v334_v29 = vrot.slane %v582_v28, 4  ;;  %s749_s7 = scalar_lea.hbm %s748_s5, 2  ;;  %p754_p7 = scmp.lt.s32.totalorder %s748_s5, %s1080_s3 }
  0x2f   : > { %p750_p4 = scmp.ne.s32.totalorder %s748_s5, %s749_s7  ;;  %p755_p8 = scmp.lt.s32.totalorder %s753_s28, %s749_s7 }
  0x30   : > { %v275_v1 = vld.sshfl [vmem:[#allocation1] sm:$0xff pattern:$0x75316420]  ;;  %v276_v2 = vld.sshfl [vmem:[#allocation1 + $0x8] sm:$0xff pattern:$0x75316420]  ;;  %v335_v32 = vsel %vm279_vm0, %v581_v30, %v334_v29 }
  0x31   : > { %v280_v3 = vsel %vm279_vm0, %v275_v1, -inf  ;;  %v287_v4 = vsel %vm279_vm0, %v276_v2, -inf  ;;  %v337_v33 = vmul.f32 %v335_v32, %v271_v0  ;;  %p751_p5 = pnand %p750_p4, %p925_p9  ;;  %p756_p10 = por %p755_p8, %p754_p7 }
  0x32   : > { %v281_v5 = vrot.slane %v280_v3, 4  ;;  %v288_v6 = vrot.slane %v287_v4, 4 }
  0x33   : > { %p752_p6 = pneg %p751_p5 }
  0x34   : > { %v282_v7 = vmax.f32 %v280_v3, %v281_v5  ;;  %v289_v8 = vmax.f32 %v287_v4, %v288_v6 }
  0x35   : > { %p757_p13 = pnand %p756_p10, %p752_p6 }
  0x36   : > { %v283_v9 = vrot.slane %v282_v7, 2  ;;  %v290_v10 = vrot.slane %v289_v8, 2 }
  0x38   : > { %v284_v11 = vmax.f32 %v282_v7, %v283_v9  ;;  %v291_v12 = vmax.f32 %v289_v8, %v290_v10 }
  0x3a   : > { %v285_v13 = vrot.slane %v284_v11, 1  ;;  %v292_v14 = vrot.slane %v291_v12, 1 }
  0x3c   : > { %v979_v17 = vmax.f32 %v291_v12, %v292_v14  ;;  %v981_v18 = vmax.f32 %v284_v11, %v285_v13  ;;  %v385_v11 = vld [vmem:[%s991_s24] sm:$0x3] }
  0x3e   : > { %v296_v19 = vrot.slane %v979_v17, 4 }
  0x40   : > { %v297_v22 = vsel %vm279_vm0, %v981_v18, %v296_v19 }
  0x41   : > { %v299_v23 = vsub.f32 %v271_v0, %v297_v22 }
  0x43   : > { %v300_v25 = vmul.f32 1.442695, %v299_v23 }
  0x45   : > { %663 = vpow2.f32 %v300_v25 }
  0x4b   : > { %v664_v31 = vpop.eup %663 }
  0x4c   : > { %303 = vst [vmem:[#allocation1] ss:$2 sm:$0xff] %v664_v31 }
  0x53   : > { %v304_v34 = vld.sshfl [vmem:[#allocation1] sm:$0xff pattern:$0x75316420]  ;;  %v305_v35 = vld.sshfl [vmem:[#allocation1 + $0x8] sm:$0xff pattern:$0x75316420] }
  0x54   : > { %v308_v36 = vsel %vm279_vm0, %v304_v34, 0.0  ;;  %v315_v37 = vsel %vm279_vm0, %v305_v35, 0.0  ;;  %339 = vst [vmem:[#allocation1] ss:$2 sm:$0xff] %v337_v33 }
  0x55   : > { %v309_v38 = vrot.slane %v308_v36, 4  ;;  %v316_v39 = vrot.slane %v315_v37, 4 }
  0x57   : > { %v310_v40 = vadd.f32 %v309_v38, %v308_v36  ;;  %v317_v41 = vadd.f32 %v316_v39, %v315_v37 }
  0x59   : > { %v311_v42 = vrot.slane %v310_v40, 2  ;;  %v318_v43 = vrot.slane %v317_v41, 2 }
  0x5b   : > { %v312_v44 = vadd.f32 %v311_v42, %v310_v40  ;;  %v319_v45 = vadd.f32 %v318_v43, %v317_v41  ;;  %v340_v46 = vld.sshfl [vmem:[#allocation1] sm:$0xff pattern:$0x75316420]  ;;  %v341_v47 = vld.sshfl [vmem:[#allocation1 + $0x8] sm:$0xff pattern:$0x75316420] }
  0x5c   : > { %v344_v48 = vsel %vm279_vm0, %v340_v46, 0.0  ;;  %v351_v49 = vsel %vm279_vm0, %v341_v47, 0.0 }
  0x5d   : > { %v313_v50 = vrot.slane %v312_v44, 1  ;;  %v320_v51 = vrot.slane %v319_v45, 1  ;;  %v345_v52 = vrot.slane %v344_v48, 4  ;;  %v352_v53 = vrot.slane %v351_v49, 4 }
  0x5f   : > { %v314_v54 = vadd.f32 %v313_v50, %v312_v44  ;;  %v321_v55 = vadd.f32 %v320_v51, %v319_v45  ;;  %v346_v56 = vadd.f32 %v345_v52, %v344_v48  ;;  %v353_v57 = vadd.f32 %v352_v53, %v351_v49 }
  0x61   : > { %665 = vlog2.f32 %v314_v54  ;;  %v347_v58 = vrot.slane %v346_v56, 2  ;;  %v354_v59 = vrot.slane %v353_v57, 2 }
  0x62   : > { %667 = vlog2.f32 %v321_v55 }
  0x63   : > { %v348_v60 = vadd.f32 %v347_v58, %v346_v56  ;;  %v355_v61 = vadd.f32 %v354_v59, %v353_v57 }
  0x65   : > { %v349_v62 = vrot.slane %v348_v60, 1  ;;  %v356_v0 = vrot.slane %v355_v61, 1 }
  0x67   : > { %v666_v63 = vpop.eup %665  ;;  %v350_v4 = vadd.f32 %v349_v62, %v348_v60  ;;  %v357_v6 = vadd.f32 %v356_v0, %v355_v61 }
  0x68   : > { %v668_v1 = vpop.eup %667  ;;  %v359_v2 = vmul.f32 0.6931472, %v666_v63 }
  0x69   : > { %v361_v3 = vmul.f32 0.6931472, %v668_v1 }
  0x6a   : > { %v362_v5 = vadd.f32 %v359_v2, %v981_v18 }
  0x6b   : > { %v363_v7 = vadd.f32 %v361_v3, %v979_v17 }
  0x6c   : > { %v364_v8 = vsub.f32 %v362_v5, %v350_v4 }
  0x6d   : > { %v365_v9 = vsub.f32 %v363_v7, %v357_v6 }
  0x6e   : > { %v366_v10 = vsub.f32 0.0, %v364_v8 }
  0x6f   : > { %v388_v12 = vrot.slane %v365_v9, 7  ;;  %v367_v13 = vsub.f32 0.0, %v365_v9 }
  0x70   : > { %v368_v14 = vmul.f32 1.442695, %v366_v10 }
  0x71   : > { %v389_v15 = vsel %vm376_vm4, %v364_v8, %v388_v12  ;;  %v370_v16 = vmul.f32 1.442695, %v367_v13 }
  0x72   : > { %v391_v17 = vadd.f32 %v389_v15, %v385_v11 }
  0x73   : > { %669 = vpow2.f32 %v370_v16 }
  0x74   : > { %392 = vst.msk [vmem:[%s991_s24] sm:$0x3] %vm986_vm1, %v391_v17  ;;  %671 = vpow2.f32 %v368_v14 }
  0x75   : > { %760 = shalt.err (!%p757_p13)
}
  0x76   : > { %595 = dma.vmem_to_hbm [thread:$0]  (%p925_p9), %s426_s30, 32, %s428_s22, %s399_s4   ;;  %v372_v19 = vld [vmem:[%s997_s18] sm:$0x3] }
  0x77   : > { %s409_s23 = scalar_lea.hbm %s1079_s2, %s585_s19  ;;  %s411_s29 = sshll.u32 %s997_s18, 4  ;;  %s412_s29 = int_to_ptr.vmem [resolvable:$true] %s411_s29 }
  0x78   : > { %s413_s5 = sshll.u32 %s409_s23, 4  ;;  %s394_s15 = scalar_lea.sflag [#allocation4], %s960_s6  ;;  %s414_s5 = int_to_ptr.hbm [resolvable:$true] %s413_s5 }
  0x79   : > { %v670_v18 = vpop.eup %669  ;;  %s775_s30 = sshra.s32 %s414_s5, 4  ;;  %s781_s7 = scalar_lea.hbm %s1079_s2, 4  ;;  %s776_s30 = int_to_ptr.hbm [resolvable:$true] %s775_s30 }
  0x7a   : > { %v375_v20 = vrot.slane %v670_v18, 7  ;;  %v672_v21 = vpop.eup %671  ;;  %s777_s22 = scalar_lea.hbm %s776_s30, 2  ;;  %p782_p3 = scmp.lt.s32.totalorder %s776_s30, %s1079_s2 }
  0x7b   : > { %p778_p0 = scmp.ne.s32.totalorder %s776_s30, %s777_s22  ;;  %p783_p4 = scmp.lt.s32.totalorder %s781_s7, %s777_s22 }
  0x7c   : > { %v377_v22 = vsel %vm376_vm4, %v672_v21, %v375_v20 }
  0x7d   : > { %v379_v23 = vadd.f32 %v377_v22, %v372_v19  ;;  %p779_p1 = pnand %p778_p0, %p925_p9  ;;  %p784_p5 = por %p783_p4, %p782_p3 }
  0x7f   : > { %384 = vst.msk [vmem:[%s997_s18] sm:$0x3] %vm986_vm1, %v379_v23  ;;  %p780_p2 = pneg %p779_p1 }
  0x81   : > { %p785_p6 = pnand %p784_p5, %p780_p2 }
  0x83   : > { %788 = shalt.err (!%p785_p6)
}
  0x84   : > { %594 = dma.vmem_to_hbm [thread:$0]  (%p925_p9), %s412_s29, 32, %s414_s5, %s394_s15  }
  0x85 PF: > { %s439_s6 = sand.u32 1, %s831_s12   ;;  %p606_p7 = pnand %p570_p12, %p932_p11 }
  0x86   : > { %s440_s18 = scalar_lea.sflag [#allocation4], %s439_s6 }
  0x87   : > { %p607_p8 = pneg %p606_p7 }
  0x89   : > { %822 = dma.done.wait (%p607_p8), %s440_s18, 32  }
  0x8a   : > { %824 = vsyncadd (%p607_p8), %s440_s18, 4294967264  ;;  %s450_s28 = scalar_lea.sflag [#allocation9], %s439_s6 }
  0x8b   : > { %826 = dma.done.wait (%p607_p8), %s450_s28, 32  }
  0x8c   : > { %828 = vsyncadd (%p607_p8), %s450_s28, 4294967264  ;;  %s26_s17 = sadd.s32 1, %s851_s17   ;;  %s1088_s12 = smov %s835_s13 }
  0x8d   : > { %p23_p10 = scmp.ge.s32.totalorder %s26_s17, 4   ;;  %s1089_s13 = smov %s839_s14 }
  0x8e   : > { %s1090_s14 = smov %s930_s26  ;;  %s1091_s15 = smov %s847_s16 }
  0x8f   : > { %s1092_s16 = smov %s1094_s20  ;;  %25 = sbr.rel (!%p23_p10) target bundleno = 10 (0xa), region = 107 }
  0x94   :  { %456 = vsyncpa [#allocation3], 1 }
  0x95   :  { %458 = vsyncpa [#allocation3 + $0x1], 1 }
  0x96   :  { %459 = vsyncpa [#allocation6], 1 }
  0x97   :  { %461 = vsyncpa [#allocation6 + $0x1], 1 }
  0x98   :  { %462 = vsyncpa [#allocation4], 1 }
  0x99   :  { %464 = vsyncpa [#allocation4 + $0x1], 1 }
  0x9a   :  { %465 = vsyncpa [#allocation9], 1 }
  0x9b   :  { %467 = vsyncpa [#allocation9 + $0x1], 1 }

</bundles_post_ra>
